<compile_context>
chip_gen: v7x
topology: tpu7x:2x2x1
jax: 0.10.0
libtpu: 0.0.40
codegen_flags: <defaults>
</compile_context>

<pallas_src>
import functools

import jax
import jax.numpy as jnp
from jax import lax
from jax.experimental import pallas as pl
from jax.experimental.pallas import tpu as pltpu


def _non_local_kernel(g_ref, w_ref, xr_ref, final_ref, mask_ref, a_ref, *,
                      tq, compute_dtype):
    # g_ref    : (1, N, C)  raw view x.view(B, H*W, C)  -- resident per batch
    # w_ref    : (C, C)     1x1-conv weight (C_out, C_in)
    # xr_ref   : (1, C, tq) channel-major view of x (residual), query tile q
    # final_ref: (1, C, tq) output tile of final = mask + x  (channel-major)
    # mask_ref : (1, C, tq) output tile of mask              (channel-major)
    # a_ref    : (C, N) f32 scratch: A = W @ g^T, computed once per batch elem
    q = pl.program_id(1)

    @pl.when(q == 0)
    def _():
        w = w_ref[...].astype(compute_dtype)                     # (C, C)
        g_all = g_ref[0].astype(compute_dtype)                   # (N, C)
        # A[o, m] = sum_c W[o, c] * g[m, c]
        a_ref[...] = lax.dot_general(
            w, g_all, (((1,), (1,)), ((), ())),
            preferred_element_type=jnp.float32)

    # query tile: rows [q*tq, q*tq + tq) of the raw view
    start = pl.multiple_of(q * tq, tq)
    g_q = g_ref[0, pl.ds(start, tq), :].astype(compute_dtype)    # (tq, C)
    g_kv = g_ref[0].astype(compute_dtype)                        # (N, C)

    # S_tile[n, m] = sum_c g_q[n, c] * g[m, c]
    s = lax.dot_general(g_q, g_kv, (((1,), (1,)), ((), ())),
                        preferred_element_type=jnp.float32)      # (tq, N)

    # numerically-stable row softmax (matches F.softmax(dim=-1))
    s_max = jnp.max(s, axis=-1, keepdims=True)
    p = jnp.exp(s - s_max)
    denom = jnp.sum(p, axis=-1, keepdims=True)
    p = p * pl.reciprocal(denom, approx=True)                    # (tq, N)

    # mask^T tile: maskT[o, n] = sum_m A[o, m] * P[n, m]
    mask_t = lax.dot_general(
        a_ref[...].astype(compute_dtype), p.astype(compute_dtype),
        (((1,), (1,)), ((), ())),
        preferred_element_type=jnp.float32)                      # (C, tq)

    mask_ref[0] = mask_t.astype(mask_ref.dtype)
    final_ref[0] = (mask_t + xr_ref[0].astype(jnp.float32)).astype(final_ref.dtype)


def non_local_direct(x, conv_w, *, tq=None, compute_dtype=jnp.bfloat16):
    """x: (B, C, H, W), conv_w: (C, C, 1, 1).  Returns (final, [x, mask])."""
    B, C, H, W = x.shape
    N = H * W
    g = x.reshape(B, N, C)      # raw view, identical to torch .view(B, -1, C)
    x_cn = x.reshape(B, C, N)   # channel-major view (free), residual / output layout
    w2d = conv_w.reshape(C, C)  # (C_out, C_in)

    if tq is None:
        # largest lane-aligned query tile that divides N (keeps VMEM bounded)
        tq = next((t for t in (512, 256, 128) if N % t == 0), N)
    assert N % tq == 0, "H*W must be divisible by the query-tile size"
    # TODO(synk): for very large H*W the (N, C) kv slab + (C, N) A scratch are
    # still resident per batch element; a kv-axis streaming (flash-style)
    # softmax would be needed to bound VMEM fully on v7x.

    kernel = functools.partial(_non_local_kernel, tq=tq,
                               compute_dtype=compute_dtype)

    final_cn, mask_cn = pl.pallas_call(
        kernel,
        out_shape=(jax.ShapeDtypeStruct((B, C, N), x.dtype),
                   jax.ShapeDtypeStruct((B, C, N), x.dtype)),
        grid=(B, N // tq),
        in_specs=[
            pl.BlockSpec((1, N, C), lambda b, q: (b, 0, 0)),    # g (resident per batch)
            pl.BlockSpec((C, C), lambda b, q: (0, 0)),          # conv weight
            pl.BlockSpec((1, C, tq), lambda b, q: (b, 0, q)),   # x residual tile
        ],
        out_specs=(
            pl.BlockSpec((1, C, tq), lambda b, q: (b, 0, q)),   # final
            pl.BlockSpec((1, C, tq), lambda b, q: (b, 0, q)),   # mask
        ),
        scratch_shapes=[pltpu.VMEM((C, N), jnp.float32)],
        compiler_params=pltpu.CompilerParams(
            # batch elems are independent -> megacore-parallel; the query axis
            # reuses the per-batch A scratch written at q == 0, so "arbitrary".
            dimension_semantics=("parallel", "arbitrary"),
            vmem_limit_bytes=48 * 1024 * 1024),
    )(g, w2d, x_cn)

    final = final_cn.reshape(B, C, H, W)   # free: already channel-major
    mask = mask_cn.reshape(B, C, H, W)
    return final, [x, mask]


def _reference(x, conv_w):
    # pure-JAX reference mirroring the PyTorch code line by line (f32)
    B, C, H, W = x.shape
    N = H * W
    g = x.reshape(B, N, C)
    s = jnp.einsum('bnc,bmc->bnm', g, g)
    p = jax.nn.softmax(s, axis=-1)
    m = jnp.einsum('bnm,bmc->bnc', p, g)
    map_chw = jnp.transpose(m, (0, 2, 1)).reshape(B, C, H, W)
    w2d = conv_w.reshape(C, C)
    mask = jnp.einsum('oc,bchw->bohw', w2d, map_chw)
    return mask + x, mask


if __name__ == "__main__":
    key = jax.random.PRNGKey(0)
    kx, kw = jax.random.split(key)

    B, C, H, W = 2, 4, 16, 16
    x = jax.random.normal(kx, (B, C, H, W), dtype=jnp.float32)
    # NOTE: the PyTorch module zero-inits conv_mask.weight (init_weights);
    # small deterministic random weights are used so the 1x1-conv path is
    # actually exercised.  Set conv_w = jnp.zeros(...) to match init exactly.
    conv_w = 0.1 * jax.random.normal(kw, (C, C, 1, 1), dtype=jnp.float32)

    # default path (bf16 MXU operands, f32 accumulation); tq=128 exercises the
    # streaming query-tile path (2 tiles per batch element).
    final, (x_out, mask) = non_local_direct(x, conv_w, tq=128)
    jax.block_until_ready(final)
    jax.block_until_ready(mask)

    ref_final, ref_mask = _reference(x, conv_w)

    assert final.shape == (B, C, H, W) and mask.shape == (B, C, H, W)
    # bf16 MXU inputs -> ~1e-2-level deviations vs the pure-f32 reference.
    assert jnp.allclose(final, ref_final, atol=5e-2, rtol=5e-2), "final (bf16) mismatch"
    assert jnp.allclose(mask, ref_mask, atol=5e-2, rtol=5e-2), "mask (bf16) mismatch"

    # f32 compute path: tighter structural / indexing check
    final32, (_, mask32) = non_local_direct(x, conv_w, tq=128,
                                            compute_dtype=jnp.float32)
    jax.block_until_ready(final32)
    assert jnp.allclose(final32, ref_final, atol=2e-2, rtol=2e-2), "final (f32) mismatch"
    assert jnp.allclose(mask32, ref_mask, atol=2e-2, rtol=2e-2), "mask (f32) mismatch"

    print("KERNEL_OK")
</pallas_src>

<mosaic_0001>
module attributes {stable_mosaic.version = 11 : i64} {
  func.func @_non_local_kernel(%arg0: i32, %arg1: i32, %arg2: memref<1x256x4xf32, #tpu.memory_space<vmem>>, %arg3: memref<4x4xf32, #tpu.memory_space<vmem>>, %arg4: memref<1x4x128xf32, #tpu.memory_space<vmem>>, %arg5: memref<1x4x128xf32, #tpu.memory_space<vmem>>, %arg6: memref<1x4x128xf32, #tpu.memory_space<vmem>>, %arg7: memref<4x256xf32, #tpu.memory_space<vmem>>) attributes {dimension_semantics = [#tpu.dimension_semantics<parallel>, #tpu.dimension_semantics<arbitrary>], iteration_bounds = array<i64: 2, 2>, scalar_prefetch = 0 : i64, scratch_operands = 1 : i64, tpu.core_type = #tpu.core_type<tc>, window_params = [{transform_indices = @transform_0, window_bounds = array<i64: 1, 256, 4>}, {pipeline_mode = #tpu.pipeline_mode<synchronous>, transform_indices = @transform_1, window_bounds = array<i64: 4, 4>}, {transform_indices = @transform_2, window_bounds = array<i64: 1, 4, 128>}, {transform_indices = @transform_3, window_bounds = array<i64: 1, 4, 128>}, {transform_indices = @transform_4, window_bounds = array<i64: 1, 4, 128>}]} {
    %c0_i32 = arith.constant 0 : i32
    %0 = arith.cmpi eq, %arg1, %c0_i32 : i32
    %1 = arith.extui %0 : i1 to i32
    %c0_i32_0 = arith.constant 0 : i32
    %2 = arith.cmpi ne, %1, %c0_i32_0 : i32
    scf.if %2 {
      %c0_19 = arith.constant 0 : index
      %c0_20 = arith.constant 0 : index
      %36 = vector.load %arg3[%c0_19, %c0_20] : memref<4x4xf32, #tpu.memory_space<vmem>>, vector<4x4xf32>
      %37 = arith.truncf %36 : vector<4x4xf32> to vector<4x4xbf16>
      %c0_21 = arith.constant 0 : index
      %c0_22 = arith.constant 0 : index
      %c0_23 = arith.constant 0 : index
      %38 = vector.load %arg2[%c0_21, %c0_22, %c0_23] : memref<1x256x4xf32, #tpu.memory_space<vmem>>, vector<1x256x4xf32>
      %39 = vector.shape_cast %38 : vector<1x256x4xf32> to vector<256x4xf32>
      %40 = arith.truncf %39 : vector<256x4xf32> to vector<256x4xbf16>
      %cst_24 = arith.constant dense<0.000000e+00> : vector<4x256xf32>
      %41 = tpu.matmul %37, %40, %cst_24 {dimension_numbers = #tpu.dot_dimension_numbers<[1], [1], [0], [0], [0, 0, 1, 0], [], []>} : vector<4x4xbf16>, vector<256x4xbf16>, vector<4x256xf32> -> vector<4x256xf32>
      %c0_25 = arith.constant 0 : index
      %c0_26 = arith.constant 0 : index
      %42 = vector.load %arg7[%c0_25, %c0_26] : memref<4x256xf32, #tpu.memory_space<vmem>>, vector<4x256xf32>
      tpu.vector_store %arg7[%c0_25, %c0_26], %41 {strides = array<i32>} : memref<4x256xf32, #tpu.memory_space<vmem>>, vector<4x256xf32>,
    } else {
    }
    %c128_i32 = arith.constant 128 : i32
    %3 = arith.muli %arg1, %c128_i32 : i32
    %4 = tpu.assume_multiple %3, 128 : i32
    %c0 = arith.constant 0 : index
    %5 = arith.index_cast %4 : i32 to index
    %c0_1 = arith.constant 0 : index
    %6 = vector.load %arg2[%c0, %5, %c0_1] : memref<1x256x4xf32, #tpu.memory_space<vmem>>, vector<1x128x4xf32>
    %7 = vector.shape_cast %6 : vector<1x128x4xf32> to vector<128x4xf32>
    %8 = arith.truncf %7 : vector<128x4xf32> to vector<128x4xbf16>
    %c0_2 = arith.constant 0 : index
    %c0_3 = arith.constant 0 : index
    %c0_4 = arith.constant 0 : index
    %9 = vector.load %arg2[%c0_2, %c0_3, %c0_4] : memref<1x256x4xf32, #tpu.memory_space<vmem>>, vector<1x256x4xf32>
    %10 = vector.shape_cast %9 : vector<1x256x4xf32> to vector<256x4xf32>
    %11 = arith.truncf %10 : vector<256x4xf32> to vector<256x4xbf16>
    %cst = arith.constant dense<0.000000e+00> : vector<128x256xf32>
    %12 = tpu.matmul %8, %11, %cst {dimension_numbers = #tpu.dot_dimension_numbers<[1], [1], [0], [0], [0, 0, 1, 0], [], []>} : vector<128x4xbf16>, vector<256x4xbf16>, vector<128x256xf32> -> vector<128x256xf32>
    %cst_5 = arith.constant dense<0xFF800000> : vector<128xf32>
    %13 = vector.multi_reduction <maximumf>, %12, %cst_5 [1] : vector<128x256xf32> to vector<128xf32>
    %14 = vector.shape_cast %13 : vector<128xf32> to vector<128x1xf32>
    %15 = vector.broadcast %14 : vector<128x1xf32> to vector<128x256xf32>
    %16 = arith.subf %12, %15 : vector<128x256xf32>
    %17 = math.exp %16 : vector<128x256xf32>
    %cst_6 = arith.constant dense<0.000000e+00> : vector<128xf32>
    %18 = vector.multi_reduction <add>, %17, %cst_6 [1] : vector<128x256xf32> to vector<128xf32>
    %19 = vector.shape_cast %18 : vector<128xf32> to vector<128x1xf32>
    %20 = tpu.reciprocal %19 {approx = true} : vector<128x1xf32> -> vector<128x1xf32>
    %21 = vector.broadcast %20 : vector<128x1xf32> to vector<128x256xf32>
    %22 = arith.mulf %17, %21 : vector<128x256xf32>
    %c0_7 = arith.constant 0 : index
    %c0_8 = arith.constant 0 : index
    %23 = vector.load %arg7[%c0_7, %c0_8] : memref<4x256xf32, #tpu.memory_space<vmem>>, vector<4x256xf32>
    %24 = arith.truncf %23 : vector<4x256xf32> to vector<4x256xbf16>
    %25 = arith.truncf %22 : vector<128x256xf32> to vector<128x256xbf16>
    %cst_9 = arith.constant dense<0.000000e+00> : vector<4x128xf32>
    %26 = tpu.matmul %24, %25, %cst_9 {dimension_numbers = #tpu.dot_dimension_numbers<[1], [1], [0], [0], [0, 0, 1, 0], [], []>} : vector<4x256xbf16>, vector<128x256xbf16>, vector<4x128xf32> -> vector<4x128xf32>
    %c0_10 = arith.constant 0 : index
    %c0_11 = arith.constant 0 : index
    %c0_12 = arith.constant 0 : index
    %27 = vector.load %arg6[%c0_10, %c0_11, %c0_12] : memref<1x4x128xf32, #tpu.memory_space<vmem>>, vector<1x4x128xf32>
    %28 = vector.shape_cast %27 : vector<1x4x128xf32> to vector<4x128xf32>
    %29 = vector.shape_cast %26 : vector<4x128xf32> to vector<1x4x128xf32>
    tpu.vector_store %arg6[%c0_10, %c0_11, %c0_12], %29 {strides = array<i32>} : memref<1x4x128xf32, #tpu.memory_space<vmem>>, vector<1x4x128xf32>,
    %c0_13 = arith.constant 0 : index
    %c0_14 = arith.constant 0 : index
    %c0_15 = arith.constant 0 : index
    %30 = vector.load %arg4[%c0_13, %c0_14, %c0_15] : memref<1x4x128xf32, #tpu.memory_space<vmem>>, vector<1x4x128xf32>
    %31 = vector.shape_cast %30 : vector<1x4x128xf32> to vector<4x128xf32>
    %32 = arith.addf %26, %31 : vector<4x128xf32>
    %c0_16 = arith.constant 0 : index
    %c0_17 = arith.constant 0 : index
    %c0_18 = arith.constant 0 : index
    %33 = vector.load %arg5[%c0_16, %c0_17, %c0_18] : memref<1x4x128xf32, #tpu.memory_space<vmem>>, vector<1x4x128xf32>
    %34 = vector.shape_cast %33 : vector<1x4x128xf32> to vector<4x128xf32>
    %35 = vector.shape_cast %32 : vector<4x128xf32> to vector<1x4x128xf32>
    tpu.vector_store %arg5[%c0_16, %c0_17, %c0_18], %35 {strides = array<i32>} : memref<1x4x128xf32, #tpu.memory_space<vmem>>, vector<1x4x128xf32>,
    return
  }
  func.func @transform_0(%arg0: i32, %arg1: i32) -> (i32, i32, i32) {
    %c0_i32 = arith.constant 0 : i32
    %c0_i32_0 = arith.constant 0 : i32
    %c0_i32_1 = arith.constant 0 : i32
    return %arg0, %c0_i32, %c0_i32_0 : i32, i32, i32
  }
  func.func @transform_1(%arg0: i32, %arg1: i32) -> (i32, i32) {
    %c0_i32 = arith.constant 0 : i32
    %c0_i32_0 = arith.constant 0 : i32
    %c0_i32_1 = arith.constant 0 : i32
    return %c0_i32, %c0_i32_0 : i32, i32
  }
  func.func @transform_2(%arg0: i32, %arg1: i32) -> (i32, i32, i32) {
    %c0_i32 = arith.constant 0 : i32
    %c0_i32_0 = arith.constant 0 : i32
    return %arg0, %c0_i32, %arg1 : i32, i32, i32
  }
  func.func @transform_3(%arg0: i32, %arg1: i32) -> (i32, i32, i32) {
    %c0_i32 = arith.constant 0 : i32
    %c0_i32_0 = arith.constant 0 : i32
    return %arg0, %c0_i32, %arg1 : i32, i32, i32
  }
  func.func @transform_4(%arg0: i32, %arg1: i32) -> (i32, i32, i32) {
    %c0_i32 = arith.constant 0 : i32
    %c0_i32_0 = arith.constant 0 : i32
    return %arg0, %c0_i32, %arg1 : i32, i32, i32
  }
}

</mosaic_0001>

<bundles_post_ra>
// kernel: tpu_custom_call.1
= control target key start
LH: loop header
LB: loop body
LE: loop exit
PB: predicated region body
PF: predicated region fallthrough
CT: control target
= control target key end

     0   :  { %10 = vsyncpa [#allocation4], 0  ;;  %s2146_s0 = inlined_call_operand.vmem [shape: f32[2,256,4], index: 0, kind: input, shape index: {}]   ;;  %s2147_s1 = inlined_call_operand.vmem [shape: f32[4,4], index: 1, kind: input, shape index: {}]   ;;  %s2148_s2 = inlined_call_operand.vmem [shape: f32[2,4,256], index: 2, kind: input, shape index: {}]   ;;  %s2149_s3 = inlined_call_operand.hbm [shape: f32[2,4,256], index: 3, kind: output, shape index: {0}]   ;;  %s2150_s4 = inlined_call_operand.hbm [shape: f32[2,4,256], index: 4, kind: output, shape index: {1}]  }
   0x1   :  { %12 = vsyncpa [#allocation4 + $0x1], 0 }
   0x2   :  { %13 = vsyncpa [#allocation6], 0 }
   0x3   :  { %15 = vsyncpa [#allocation6 + $0x1], 0  ;;  %s1560_s15 = smov 0   ;;  %s1562_s16 = smov 0  }
   0x4   :  { %s1564_s17 = smov 0   ;;  %s1566_s18 = smov 0  }
   0x5   :  { %s1568_s19 = smov 0   ;;  %s1570_s20 = smov 0  }
   0x6   :  { %s1572_s21 = smov 0   ;;  %s1574_s22 = smov 0  }
   0x7 LB: > { %2154 = sst [smem:[#allocation9_spill]] %s1527_s21  ;;  %s1135_s23 = sadd.s32 4294967295, %s1531_s22   ;;  %s1531_s22 = sphi %s1574_s22, %s21_s22   ;;  %s1527_s21 = sphi %s1572_s21, %s2161_s21   ;;  %s1523_s20 = sphi %s1570_s20, %s2166_s20   ;;  %s1519_s19 = sphi %s1568_s19, %s2159_s19   ;;  %s1515_s18 = sphi %s1566_s18, %s2165_s18   ;;  %s1511_s17 = sphi %s1564_s17, %s2164_s17   ;;  %s1507_s16 = sphi %s1562_s16, %s2163_s16   ;;  %s1503_s15 = sphi %s1560_s15, %s2162_s15  }
   0x8   : > { %s1136_s24 = sadd.s32 4294967294, %s1531_s22   ;;  %s30_s25 = sadd.s32 1, %s1523_s20 }
   0x9   : > { %p31_p0 = scmp.ge.s32.totalorder %s30_s25, 2  ;;  %s33_s26 = sadd.s32 1, %s1527_s21 }
   0xa   : > { %p127_p1 = scmp.ne.s32.totalorder %s1511_s17, %s1507_s16  ;;  %p128_p2 = scmp.eq.s32.totalorder %s1135_s23, 3 }
   0xb   : > { %s2168_s25 = smov (%p31_p0, %s30_s25), 0  ;;  %s2170_s26 = smov (!%p31_p0, %s33_s26), %s1527_s21 }
   0xc   : > { %2155 = sst [smem:[#allocation10_spill]] %s2168_s25  ;;  %s113_s27 = ssub.s32 %s1523_s20, %s2168_s25 }
   0xd   : > { %p1611_p3 = por %p128_p2, %p127_p1  ;;  %p35_p4 = scmp.ge.s32.totalorder %s2170_s26, 2 }
   0xe   : > { %p133_p5 = scmp.ne.s32.totalorder %s1507_s16, %s1503_s15  ;;  %p134_p6 = scmp.eq.s32.totalorder %s1136_s24, 3 }
   0xf   : > { %p1139_p7 = scmp.ge.s32.totalorder %s1531_s22, 1  ;;  %s2172_s26 = smov (%p35_p4, %s2170_s26), 0 }
  0x10   : > { %2157 = sst [smem:[#allocation11_spill]] %s2172_s26  ;;  %p1620_p8 = por %p134_p6, %p133_p5 }
  0x11   : > { %p202_p9 = scmp.lt.s32.totalorder %s1531_s22, 5  ;;  %s112_s30 = ssub.s32 %s1527_s21, %s2172_s26 }
  0x12   : > { %s117_s5 = sadd.s32 1, %s1511_s17  ;;  %s114_s6 = sor.u32 %s113_s27, %s112_s30 }
  0x13   : > { %p203_p10 = pnand %p1139_p7, %p202_p9  ;;  %p115_p11 = scmp.eq.s32.totalorder %s114_s6, 0 }
  0x14   : > { %s1632_s8 = sand.u32 (!%p203_p10), 1, %s1507_s16   ;;  %p241_p12 = scmp.lt.s32.totalorder (!%p203_p10), %s1519_s19, 1 }
  0x15   : > { %s1629_s7 = scalar_select %p115_p11, %s1511_s17, %s117_s5  }
  0x16   : > { %206 = sbr.rel (%p203_p10) target bundleno = 1240 (0x4d8), region = 32  ;;  %s1140_s9 = sshll.u32 (!%p203_p10), %s1632_s8, 2 }
  0x17   : > { %p248_p13 = scmp.lt.s32.totalorder (!%p203_p10), %s1515_s18, 1  ;;  %s1649_s25 = scalar_lea.vmem (!%p203_p10), [#allocation3], %s1140_s9 }
  0x18   : > { %s1651_s21 = scalar_lea.vmem (!%p203_p10), [#allocation5], %s1140_s9  ;;  %p1146_p0 = scmp.ne.s32.totalorder (!%p203_p10), %s1515_s18, 0 }
  0x1d   : > { %s242_s10 = scalar_select %p241_p12, %s1519_s19, 1 }
  0x1e   : > { %s249_s11 = scalar_select %p248_p13, %s1515_s18, 1 }
  0x1f   : > { %s1165_s12 = sshll.u32 %s242_s10, 8  ;;  %s1144_s13 = sshll.u32 %s242_s10, 1  ;;  %vm309_vm0 = vcmask (!%p1146_p0), 31744   ;;  %v259_v17 = vld [vmem:[%s2147_s1] sm:$0xf] (!%p1146_p0) }
  0x20   : > { %s1642_s24 = scalar_lea.vmem %s2146_s0, %s1165_s12  ;;  %s251_s27 = sadd.s32 %s1144_s13, %s249_s11  ;;  %v260_v20 = vpack.c.bf16 (!%p1146_p0), %v259_v17, %v259_v17 }
  0x21   : > { %s1145_s30 = sshll.u32 %s251_s27, 2  ;;  %258 = sbr.rel (%p1146_p0) target bundleno = 317 (0x13d), region = 36  ;;  %v277_v0 = vld [vmem:[%s1642_s24 + $0x80] sm:$0xff] (!%p1146_p0)  ;;  %v278_v1 = vld [vmem:[%s1642_s24 + $0x88] sm:$0xff] (!%p1146_p0)  ;;  %v279_v5 = vld [vmem:[%s1642_s24 + $0x90] sm:$0xff] (!%p1146_p0) }
  0x22   : > { %s1647_s26 = scalar_lea.vmem %s2148_s2, %s1145_s30  ;;  %v261_v2 = vld [vmem:[%s1642_s24] sm:$0xff] (!%p1146_p0)  ;;  %v301_v3 = vpack.c.bf16 (!%p1146_p0), %v278_v1, %v277_v0  ;;  %v262_v4 = vld [vmem:[%s1642_s24 + $0x8] sm:$0xff] (!%p1146_p0)  ;;  %v280_v6 = vld [vmem:[%s1642_s24 + $0x98] sm:$0xff] (!%p1146_p0)  ;;  %1182 = vmatprep.mubr.msk.bf16.mxu0 (!%p1146_p0), %vm309_vm0, %v260_v20 }
  0x23   : > { %v293_v7 = vpack.c.bf16 (!%p1146_p0), %v262_v4, %v261_v2  ;;  %v302_v8 = vpack.c.bf16 (!%p1146_p0), %v280_v6, %v279_v5  ;;  %v263_v9 = vld [vmem:[%s1642_s24 + $0x10] sm:$0xff] (!%p1146_p0)  ;;  %v264_v10 = vld [vmem:[%s1642_s24 + $0x18] sm:$0xff] (!%p1146_p0)  ;;  %v281_v13 = vld [vmem:[%s1642_s24 + $0xa0] sm:$0xff] (!%p1146_p0) }
  0x24   : > { %1216 = vmatprep.subr.msk.bf16.mxu0 (!%p1146_p0), %vm309_vm0, %v301_v3  ;;  %v294_v12 = vpack.c.bf16 (!%p1146_p0), %v264_v10, %v263_v9  ;;  %v282_v14 = vld [vmem:[%s1642_s24 + $0xa8] sm:$0xff] (!%p1146_p0)  ;;  %v265_v18 = vld [vmem:[%s1642_s24 + $0x20] sm:$0xff] (!%p1146_p0)  ;;  %v283_v22 = vld [vmem:[%s1642_s24 + $0xb0] sm:$0xff] (!%p1146_p0) }
  0x25   : > { %v314_v11 = vsel (!%p1146_p0), %vm309_vm0, %v293_v7, 0  ;;  %v303_v16 = vpack.c.bf16 (!%p1146_p0), %v282_v14, %v281_v13  ;;  %v266_v19 = vld [vmem:[%s1642_s24 + $0x28] sm:$0xff] (!%p1146_p0)  ;;  %v284_v23 = vld [vmem:[%s1642_s24 + $0xb8] sm:$0xff] (!%p1146_p0)  ;;  %v267_v26 = vld [vmem:[%s1642_s24 + $0x30] sm:$0xff] (!%p1146_p0) }
  0x26   : > { %1167 = vmatpush3.bf16.xpose.msra.mxu0 (!%p1146_p0), %v314_v11  ;;  %v317_v15 = vsel (!%p1146_p0), %vm309_vm0, %v294_v12, 0  ;;  %v295_v21 = vpack.c.bf16 (!%p1146_p0), %v266_v19, %v265_v18  ;;  %v304_v25 = vpack.c.bf16 (!%p1146_p0), %v284_v23, %v283_v22  ;;  %v268_v27 = vld [vmem:[%s1642_s24 + $0x38] sm:$0xff] (!%p1146_p0)  ;;  %v285_v29 = vld [vmem:[%s1642_s24 + $0xc0] sm:$0xff] (!%p1146_p0)  ;;  %v286_v30 = vld [vmem:[%s1642_s24 + $0xc8] sm:$0xff] (!%p1146_p0) }
  0x27   : > { %1217 = vmatprep.subr.msk.bf16.mxu0 (!%p1146_p0), %vm309_vm0, %v302_v8  ;;  %v296_v28 = vpack.c.bf16 (!%p1146_p0), %v268_v27, %v267_v26  ;;  %v305_v32 = vpack.c.bf16 (!%p1146_p0), %v286_v30, %v285_v29  ;;  %v269_v33 = vld [vmem:[%s1642_s24 + $0x40] sm:$0xff] (!%p1146_p0)  ;;  %v270_v34 = vld [vmem:[%s1642_s24 + $0x48] sm:$0xff] (!%p1146_p0)  ;;  %v287_v36 = vld [vmem:[%s1642_s24 + $0xd0] sm:$0xff] (!%p1146_p0) }
  0x28   : > { %v320_v24 = vsel %vm309_vm0, %v295_v21, 0  ;;  %v297_v35 = vpack.c.bf16 %v270_v34, %v269_v33  ;;  %v288_v37 = vld [vmem:[%s1642_s24 + $0xd8] sm:$0xff]  ;;  %v271_v40 = vld [vmem:[%s1642_s24 + $0x50] sm:$0xff]  ;;  %v289_v43 = vld [vmem:[%s1642_s24 + $0xe0] sm:$0xff] }
  0x29   : > { %v323_v31 = vsel %vm309_vm0, %v296_v28, 0  ;;  %v306_v39 = vpack.c.bf16 %v288_v37, %v287_v36  ;;  %v272_v41 = vld [vmem:[%s1642_s24 + $0x58] sm:$0xff]  ;;  %v290_v44 = vld [vmem:[%s1642_s24 + $0xe8] sm:$0xff]  ;;  %v273_v47 = vld [vmem:[%s1642_s24 + $0x60] sm:$0xff] }
  0x2a   : > { %v326_v38 = vsel %vm309_vm0, %v297_v35, 0  ;;  %v298_v42 = vpack.c.bf16 %v272_v41, %v271_v40  ;;  %v307_v46 = vpack.c.bf16 %v290_v44, %v289_v43  ;;  %v274_v48 = vld [vmem:[%s1642_s24 + $0x68] sm:$0xff]  ;;  %v291_v50 = vld [vmem:[%s1642_s24 + $0xf0] sm:$0xff]  ;;  %v292_v51 = vld [vmem:[%s1642_s24 + $0xf8] sm:$0xff] }
  0x2b   : > { %v299_v49 = vpack.c.bf16 %v274_v48, %v273_v47  ;;  %v308_v53 = vpack.c.bf16 %v292_v51, %v291_v50  ;;  %v275_v54 = vld [vmem:[%s1642_s24 + $0x70] sm:$0xff]  ;;  %v276_v55 = vld [vmem:[%s1642_s24 + $0x78] sm:$0xff] }
  0x2c   : > { %v329_v45 = vsel %vm309_vm0, %v298_v42, 0  ;;  %v300_v56 = vpack.c.bf16 %v276_v55, %v275_v54 }
  0x2d   : > { %v332_v52 = vsel %vm309_vm0, %v299_v49, 0 }
  0x2e   : > { %1169 = vmatpush3.bf16.xpose.msra.mxu0 %v317_v15  ;;  %v335_v57 = vsel %vm309_vm0, %v300_v56, 0 }
  0x2f   : > { %1218 = vmatprep.subr.msk.bf16.mxu0 %vm309_vm0, %v303_v16 }
  0x36   : > { %1171 = vmatpush3.bf16.xpose.msra.mxu0 %v320_v24 }
  0x37   : > { %1219 = vmatprep.subr.msk.bf16.mxu0 %vm309_vm0, %v304_v25 }
  0x3e   : > { %1173 = vmatpush3.bf16.xpose.msra.mxu0 %v323_v31 }
  0x3f   : > { %1220 = vmatprep.subr.msk.bf16.mxu0 %vm309_vm0, %v305_v32 }
  0x46   : > { %1175 = vmatpush3.bf16.xpose.msra.mxu0 %v326_v38 }
  0x47   : > { %1221 = vmatprep.subr.msk.bf16.mxu0 %vm309_vm0, %v306_v39 }
  0x4e   : > { %1177 = vmatpush3.bf16.xpose.msra.mxu0 %v329_v45 }
  0x4f   : > { %1222 = vmatprep.subr.msk.bf16.mxu0 %vm309_vm0, %v307_v46 }
  0x56   : > { %1179 = vmatpush3.bf16.xpose.msra.mxu0 %v332_v52 }
  0x57   : > { %1223 = vmatprep.subr.msk.bf16.mxu0 %vm309_vm0, %v308_v53 }
  0x5e   : > { %1181 = vmatpush3.bf16.xpose.msra.mxu0 %v335_v57 }
  0x65   : > { %1183 = vmatmul.mubr.msk.bf16.vlgmr.msra.gmra.mrb[0].mxu0 %vm309_vm0, %v260_v20 }
 0x138   : > { %v395_v58 = vpop.f32.mrb[0].mxu0 }
 0x139   : > { %v397_v59 = vpop.f32.mrb[1].mxu0 }
 0x13a   : > { %v404_v60 = vcombine.low %v395_v58, %v397_v59  ;;  %v399_v61 = vpop.f32.mrb[2].mxu0 }
 0x13b   : > { %v400_v62 = vpop.f32.mrb[3].mxu0 }
 0x13c   : > { %406 = vst [vmem:[#allocation2] sm:$0xff] %v404_v60 }
 0x13d PF: > { %v449_v63 = vld [vmem:[%s1642_s24 + $0x80] sm:$0xff]  ;;  %v450_v0 = vld [vmem:[%s1642_s24 + $0x88] sm:$0xff]  ;;  %vm481_vm1 = vcmask 31744   ;;  %v451_v4 = vld [vmem:[%s1642_s24 + $0x90] sm:$0xff]  ;;  %s1148_s11 = sshll.u32 %s1515_s18, 7  ;;  %s1159_s13 = sshll.u32 %s1519_s19, 1 }
 0x13e   : > { %v433_v1 = vld [vmem:[%s1642_s24] sm:$0xff]  ;;  %v473_v2 = vpack.c.bf16 %v450_v0, %v449_v63  ;;  %v434_v3 = vld [vmem:[%s1642_s24 + $0x8] sm:$0xff]  ;;  %v452_v5 = vld [vmem:[%s1642_s24 + $0x98] sm:$0xff]  ;;  %s1722_s12 = scalar_lea.vmem %s1642_s24, %s1148_s11  ;;  %s990_s14 = sadd.s32 %s1515_s18, %s1159_s13 }
 0x13f   : > { %v465_v6 = vpack.c.bf16 %v434_v3, %v433_v1  ;;  %v474_v7 = vpack.c.bf16 %v452_v5, %v451_v4  ;;  %v435_v8 = vld [vmem:[%s1642_s24 + $0x10] sm:$0xff]  ;;  %v436_v9 = vld [vmem:[%s1642_s24 + $0x18] sm:$0xff]  ;;  %v453_v12 = vld [vmem:[%s1642_s24 + $0xa0] sm:$0xff]  ;;  %s1160_s23 = sshll.u32 %s990_s14, 6  ;;  %s994_s27 = sshll.u32 %s1649_s25, 4  ;;  %s2071_s27 = int_to_ptr.vmem [resolvable:$true] %s994_s27 }
 0x140   : > { %1224 = vmatprep.subr.msk.bf16.mxu0 %vm481_vm1, %v473_v2  ;;  %v466_v11 = vpack.c.bf16 %v436_v9, %v435_v8  ;;  %v454_v13 = vld [vmem:[%s1642_s24 + $0xa8] sm:$0xff]  ;;  %v409_v16 = vld [vmem:[%s1722_s12] sm:$0xff]  ;;  %v455_v22 = vld [vmem:[%s1642_s24 + $0xb0] sm:$0xff]  ;;  %s2061_s6 = scalar_lea.hbm %s2150_s4, %s1160_s23  ;;  %s2069_s9 = scalar_lea.hbm %s2149_s3, %s1160_s23 }
 0x141   : > { %v507_v10 = vsel %vm481_vm1, %v465_v6, 0  ;;  %v475_v15 = vpack.c.bf16 %v454_v13, %v453_v12  ;;  %v437_v17 = vld [vmem:[%s1642_s24 + $0x20] sm:$0xff]  ;;  %v438_v18 = vld [vmem:[%s1642_s24 + $0x28] sm:$0xff]  ;;  %v456_v23 = vld [vmem:[%s1642_s24 + $0xb8] sm:$0xff]  ;;  %s1533_s11 = smov [#allocation5]  }
 0x142   : > { %1185 = vmatpush3.bf16.xpose.msra.mxu0 %v507_v10  ;;  %v510_v14 = vsel %vm481_vm1, %v466_v11, 0  ;;  %v410_v19 = vld [vmem:[%s1722_s12 + $0x8] sm:$0xff]  ;;  %v467_v21 = vpack.c.bf16 %v438_v18, %v437_v17  ;;  %v476_v25 = vpack.c.bf16 %v456_v23, %v455_v22  ;;  %v439_v26 = vld [vmem:[%s1642_s24 + $0x30] sm:$0xff]  ;;  %v440_v27 = vld [vmem:[%s1642_s24 + $0x38] sm:$0xff] }
 0x143   : > { %1225 = vmatprep.subr.msk.bf16.mxu0 %vm481_vm1, %v474_v7  ;;  %v425_v20 = vpack.c.bf16 %v410_v19, %v409_v16  ;;  %v468_v28 = vpack.c.bf16 %v440_v27, %v439_v26  ;;  %v457_v29 = vld [vmem:[%s1642_s24 + $0xc0] sm:$0xff]  ;;  %v458_v30 = vld [vmem:[%s1642_s24 + $0xc8] sm:$0xff]  ;;  %v459_v36 = vld [vmem:[%s1642_s24 + $0xd0] sm:$0xff] }
 0x144   : > { %v513_v24 = vsel %vm481_vm1, %v467_v21, 0  ;;  %v477_v32 = vpack.c.bf16 %v458_v30, %v457_v29  ;;  %v441_v33 = vld [vmem:[%s1642_s24 + $0x40] sm:$0xff]  ;;  %v442_v34 = vld [vmem:[%s1642_s24 + $0x48] sm:$0xff]  ;;  %v460_v37 = vld [vmem:[%s1642_s24 + $0xd8] sm:$0xff] }
 0x145   : > { %1200 = vmatprep.mubr.msk.bf16.mxu0 %vm481_vm1, %v425_v20  ;;  %v516_v31 = vsel %vm481_vm1, %v468_v28, 0  ;;  %v469_v35 = vpack.c.bf16 %v442_v34, %v441_v33  ;;  %v478_v39 = vpack.c.bf16 %v460_v37, %v459_v36  ;;  %v443_v40 = vld [vmem:[%s1642_s24 + $0x50] sm:$0xff]  ;;  %v444_v41 = vld [vmem:[%s1642_s24 + $0x58] sm:$0xff]  ;;  %v461_v43 = vld [vmem:[%s1642_s24 + $0xe0] sm:$0xff] }
 0x146   : > { %v470_v42 = vpack.c.bf16 %v444_v41, %v443_v40  ;;  %v462_v44 = vld [vmem:[%s1642_s24 + $0xe8] sm:$0xff]  ;;  %v445_v47 = vld [vmem:[%s1642_s24 + $0x60] sm:$0xff]  ;;  %v463_v50 = vld [vmem:[%s1642_s24 + $0xf0] sm:$0xff] }
 0x147   : > { %v519_v38 = vsel %vm481_vm1, %v469_v35, 0  ;;  %v479_v46 = vpack.c.bf16 %v462_v44, %v461_v43  ;;  %v446_v48 = vld [vmem:[%s1642_s24 + $0x68] sm:$0xff]  ;;  %v464_v51 = vld [vmem:[%s1642_s24 + $0xf8] sm:$0xff]  ;;  %v447_v54 = vld [vmem:[%s1642_s24 + $0x70] sm:$0xff] }
 0x148   : > { %v522_v45 = vsel %vm481_vm1, %v470_v42, 0  ;;  %v471_v49 = vpack.c.bf16 %v446_v48, %v445_v47  ;;  %v480_v53 = vpack.c.bf16 %v464_v51, %v463_v50  ;;  %v448_v55 = vld [vmem:[%s1642_s24 + $0x78] sm:$0xff]  ;;  %v411_v58 = vld [vmem:[%s1722_s12 + $0x10] sm:$0xff]  ;;  %v413_v61 = vld [vmem:[%s1722_s12 + $0x20] sm:$0xff]  ;;  %s1009_s24 = sshll.u32 %s1651_s21, 4  ;;  %s2063_s24 = int_to_ptr.vmem [resolvable:$true] %s1009_s24 }
 0x149   : > { %v472_v56 = vpack.c.bf16 %v448_v55, %v447_v54  ;;  %v412_v59 = vld [vmem:[%s1722_s12 + $0x18] sm:$0xff]  ;;  %v414_v62 = vld [vmem:[%s1722_s12 + $0x28] sm:$0xff]  ;;  %v415_v0 = vld [vmem:[%s1722_s12 + $0x30] sm:$0xff]  ;;  %s1405_s10 = scalar_lea.vmem %s2063_s24, 64 }
 0x14a   : > { %1187 = vmatpush3.bf16.xpose.msra.mxu0 %v510_v14  ;;  %v525_v52 = vsel %vm481_vm1, %v471_v49, 0  ;;  %v426_v60 = vpack.c.bf16 %v412_v59, %v411_v58  ;;  %v427_v63 = vpack.c.bf16 %v414_v62, %v413_v61  ;;  %v416_v1 = vld [vmem:[%s1722_s12 + $0x38] sm:$0xff]  ;;  %v417_v3 = vld [vmem:[%s1722_s12 + $0x40] sm:$0xff]  ;;  %v418_v4 = vld [vmem:[%s1722_s12 + $0x48] sm:$0xff]  ;;  %p1406_p1 = scmp.ne.s32.totalorder %s2063_s24, %s1405_s10 }
 0x14b   : > { %1226 = vmatprep.subr.msk.bf16.mxu0 %vm481_vm1, %v475_v15  ;;  %v528_v57 = vsel %vm481_vm1, %v472_v56, 0  ;;  %v428_v2 = vpack.c.bf16 %v416_v1, %v415_v0  ;;  %v429_v5 = vpack.c.bf16 %v418_v4, %v417_v3  ;;  %v419_v6 = vld [vmem:[%s1722_s12 + $0x50] sm:$0xff]  ;;  %v420_v7 = vld [vmem:[%s1722_s12 + $0x58] sm:$0xff]  ;;  %v421_v9 = vld [vmem:[%s1722_s12 + $0x60] sm:$0xff] }
 0x14c   : > { %v430_v8 = vpack.c.bf16 %v420_v7, %v419_v6  ;;  %v422_v10 = vld [vmem:[%s1722_s12 + $0x68] sm:$0xff]  ;;  %v423_v12 = vld [vmem:[%s1722_s12 + $0x70] sm:$0xff]  ;;  %v424_v13 = vld [vmem:[%s1722_s12 + $0x78] sm:$0xff]  ;;  %p1407_p2 = pnand %p1406_p1, %p1611_p3  ;;  %s1409_s12 = sshll.u32 %s1533_s11, 4  ;;  %s1410_s12 = int_to_ptr.vmem [resolvable:$false] %s1409_s12 }
 0x14d   : > { %v431_v11 = vpack.c.bf16 %v422_v10, %v421_v9  ;;  %v432_v14 = vpack.c.bf16 %v424_v13, %v423_v12  ;;  %p1412_p5 = scmp.lt.s32.totalorder %s2063_s24, %s1410_s12 }
 0x14e   : > { %p1408_p4 = pneg %p1407_p2 }
 0x152   : > { %1189 = vmatpush3.bf16.xpose.msra.mxu0 %v513_v24 }
 0x153   : > { %1227 = vmatprep.subr.msk.bf16.mxu0 %vm481_vm1, %v476_v25 }
 0x15a   : > { %1191 = vmatpush3.bf16.xpose.msra.mxu0 %v516_v31 }
 0x15b   : > { %1228 = vmatprep.subr.msk.bf16.mxu0 %vm481_vm1, %v477_v32 }
 0x162   : > { %1193 = vmatpush3.bf16.xpose.msra.mxu0 %v519_v38 }
 0x163   : > { %1229 = vmatprep.subr.msk.bf16.mxu0 %vm481_vm1, %v478_v39 }
 0x16a   : > { %1195 = vmatpush3.bf16.xpose.msra.mxu0 %v522_v45 }
 0x16b   : > { %1230 = vmatprep.subr.msk.bf16.mxu0 %vm481_vm1, %v479_v46 }
 0x172   : > { %1197 = vmatpush3.bf16.xpose.msra.mxu0 %v525_v52 }
 0x173   : > { %1231 = vmatprep.subr.msk.bf16.mxu0 %vm481_vm1, %v480_v53 }
 0x17a   : > { %1199 = vmatpush3.bf16.xpose.msra.mxu0 %v528_v57 }
 0x181   : > { %1201 = vmatmul.mubr.msk.bf16.vlgmr.msra.gmra.mrb[0].mxu0 %vm481_vm1, %v425_v20 }
 0x182   : > { %1202 = vmatprep.mubr.msk.bf16.mxu0 %vm481_vm1, %v426_v60 }
 0x189   : > { %1203 = vmatmul.mubr.msk.bf16.gmra.mrb[4].mxu0 %vm481_vm1, %v426_v60 }
 0x18a   : > { %1204 = vmatprep.mubr.msk.bf16.mxu0 %vm481_vm1, %v427_v63 }
 0x191   : > { %1205 = vmatmul.mubr.msk.bf16.gmra.mrb[8].mxu0 %vm481_vm1, %v427_v63 }
 0x192   : > { %1206 = vmatprep.mubr.msk.bf16.mxu0 %vm481_vm1, %v428_v2 }
 0x199   : > { %1207 = vmatmul.mubr.msk.bf16.gmra.mrb[12].mxu0 %vm481_vm1, %v428_v2 }
 0x19a   : > { %1208 = vmatprep.mubr.msk.bf16.mxu0 %vm481_vm1, %v429_v5 }
 0x1a1   : > { %1209 = vmatmul.mubr.msk.bf16.gmra.mrb[16].mxu0 %vm481_vm1, %v429_v5 }
 0x1a2   : > { %1210 = vmatprep.mubr.msk.bf16.mxu0 %vm481_vm1, %v430_v8 }
 0x1a9   : > { %1211 = vmatmul.mubr.msk.bf16.gmra.mrb[20].mxu0 %vm481_vm1, %v430_v8 }
 0x1aa   : > { %1212 = vmatprep.mubr.msk.bf16.mxu0 %vm481_vm1, %v431_v11 }
 0x1b1   : > { %1213 = vmatmul.mubr.msk.bf16.gmra.mrb[24].mxu0 %vm481_vm1, %v431_v11 }
 0x1b2   : > { %1214 = vmatprep.mubr.msk.bf16.mxu0 %vm481_vm1, %v432_v14 }
 0x1b9   : > { %1215 = vmatmul.mubr.msk.bf16.gmra.mrb[28].mxu0 %vm481_vm1, %v432_v14 }
 0x254   : > { %v1791_v15 = vpop.f32.mrb[0].mxu0 }
 0x255   : > { %v1793_v16 = vpop.f32.mrb[1].mxu0 }
 0x256   : > { %v1795_v17 = vpop.f32.mrb[2].mxu0  ;;  %v667_v18 = vmax.f32 %v1791_v15, %v1793_v16 }
 0x257   : > { %v1799_v19 = vpop.f32.mrb[3].mxu0 }
 0x258   : > { %668 = vmax.xlane.f32.xlu0 %v667_v18  ;;  %v670_v20 = vmax.f32 %v1795_v17, %v1799_v19 }
 0x25c   : > { %671 = vmax.xlane.f32.xlu0 %v670_v20  ;;  %v1803_v21 = vpop.f32.mrb[4].mxu0 }
 0x25d   : > { %v1805_v22 = vpop.f32.mrb[5].mxu0 }
 0x25e   : > { %v1807_v23 = vpop.f32.mrb[6].mxu0  ;;  %v673_v24 = vmax.f32 %v1803_v21, %v1805_v22 }
 0x25f   : > { %v1811_v25 = vpop.f32.mrb[7].mxu0 }
 0x260   : > { %674 = vmax.xlane.f32.xlu1 %v673_v24  ;;  %v676_v26 = vmax.f32 %v1807_v23, %v1811_v25 }
 0x264   : > { %677 = vmax.xlane.f32.xlu1 %v676_v26  ;;  %v1815_v27 = vpop.f32.mrb[8].mxu0 }
 0x265   : > { %v1817_v28 = vpop.f32.mrb[9].mxu0 }
 0x266   : > { %v1819_v29 = vpop.f32.mrb[10].mxu0  ;;  %v679_v30 = vmax.f32 %v1815_v27, %v1817_v28 }
 0x267   : > { %v1823_v31 = vpop.f32.mrb[11].mxu0 }
 0x268   : > { %680 = vmax.xlane.f32.xlu0 %v679_v30  ;;  %v682_v32 = vmax.f32 %v1819_v29, %v1823_v31 }
 0x26a   : > { %683 = vmax.xlane.f32.xlu1 %v682_v32 }
 0x26c   : > { %v1827_v33 = vpop.f32.mrb[12].mxu0 }
 0x26d   : > { %v1829_v34 = vpop.f32.mrb[13].mxu0 }
 0x26e   : > { %v1831_v35 = vpop.f32.mrb[14].mxu0  ;;  %v685_v36 = vmax.f32 %v1827_v33, %v1829_v34 }
 0x26f   : > { %v1835_v37 = vpop.f32.mrb[15].mxu0 }
 0x270   : > { %686 = vmax.xlane.f32.xlu0 %v685_v36  ;;  %v688_v38 = vmax.f32 %v1831_v35, %v1835_v37 }
 0x272   : > { %689 = vmax.xlane.f32.xlu1 %v688_v38 }
 0x274   : > { %v1839_v39 = vpop.f32.mrb[16].mxu0 }
 0x275   : > { %v1841_v40 = vpop.f32.mrb[17].mxu0 }
 0x276   : > { %v1843_v41 = vpop.f32.mrb[18].mxu0  ;;  %v691_v42 = vmax.f32 %v1839_v39, %v1841_v40 }
 0x277   : > { %v1847_v43 = vpop.f32.mrb[19].mxu0 }
 0x278   : > { %692 = vmax.xlane.f32.xlu0 %v691_v42  ;;  %v694_v44 = vmax.f32 %v1843_v41, %v1847_v43 }
 0x27a   : > { %695 = vmax.xlane.f32.xlu1 %v694_v44 }
 0x27c   : > { %v1851_v45 = vpop.f32.mrb[20].mxu0 }
 0x27d   : > { %v1853_v46 = vpop.f32.mrb[21].mxu0 }
 0x27e   : > { %v1855_v47 = vpop.f32.mrb[22].mxu0  ;;  %v697_v48 = vmax.f32 %v1851_v45, %v1853_v46 }
 0x27f   : > { %v1859_v49 = vpop.f32.mrb[23].mxu0 }
 0x280   : > { %698 = vmax.xlane.f32.xlu0 %v697_v48  ;;  %v700_v50 = vmax.f32 %v1855_v47, %v1859_v49 }
 0x282   : > { %701 = vmax.xlane.f32.xlu1 %v700_v50 }
 0x284   : > { %v1863_v51 = vpop.f32.mrb[24].mxu0 }
 0x285   : > { %v1865_v52 = vpop.f32.mrb[25].mxu0 }
 0x286   : > { %v1867_v53 = vpop.f32.mrb[26].mxu0  ;;  %v703_v54 = vmax.f32 %v1863_v51, %v1865_v52 }
 0x287   : > { %v1871_v55 = vpop.f32.mrb[27].mxu0 }
 0x288   : > { %704 = vmax.xlane.f32.xlu0 %v703_v54  ;;  %v706_v56 = vmax.f32 %v1867_v53, %v1871_v55 }
 0x28a   : > { %707 = vmax.xlane.f32.xlu1 %v706_v56 }
 0x28c   : > { %v1875_v57 = vpop.f32.mrb[28].mxu0 }
 0x28d   : > { %v1877_v58 = vpop.f32.mrb[29].mxu0 }
 0x28e   : > { %v1879_v59 = vpop.f32.mrb[30].mxu0  ;;  %v709_v60 = vmax.f32 %v1875_v57, %v1877_v58 }
 0x28f   : > { %v1883_v61 = vpop.f32.mrb[31].mxu0 }
 0x290   : > { %v712_v62 = vmax.f32 %v1879_v59, %v1883_v61  ;;  %710 = vmax.xlane.f32.xlu0 %v709_v60 }
 0x292   : > { %713 = vmax.xlane.f32.xlu1 %v712_v62 }
 0x2e5   : > { %v669_v63 = vpop.xlane.xlu0 %668 }
 0x2e6   : > { %v715_v0 = vsub.f32 %v1791_v15, %v669_v63  ;;  %v716_v1 = vsub.f32 %v1793_v16, %v669_v63 }
 0x2e8   : > { %v747_v2 = vmul.f32 1.442695, %v715_v0  ;;  %v749_v3 = vmul.f32 1.442695, %v716_v1 }
 0x2e9   : > { %v672_v4 = vpop.xlane.xlu0 %671 }
 0x2ea   : > { %1309 = vpow2.f32 %v747_v2  ;;  %v717_v5 = vsub.f32 %v1795_v17, %v672_v4  ;;  %v718_v6 = vsub.f32 %v1799_v19, %v672_v4 }
 0x2eb   : > { %1311 = vpow2.f32 %v749_v3 }
 0x2ec   : > { %v751_v7 = vmul.f32 1.442695, %v717_v5  ;;  %v753_v8 = vmul.f32 1.442695, %v718_v6 }
 0x2ed   : > { %v675_v9 = vpop.xlane.xlu1 %674 }
 0x2ee   : > { %1313 = vpow2.f32 %v751_v7  ;;  %v719_v10 = vsub.f32 %v1803_v21, %v675_v9  ;;  %v720_v11 = vsub.f32 %v1805_v22, %v675_v9 }
 0x2ef   : > { %1315 = vpow2.f32 %v753_v8 }
 0x2f0   : > { %v755_v12 = vmul.f32 1.442695, %v719_v10  ;;  %v757_v13 = vmul.f32 1.442695, %v720_v11 }
 0x2f1   : > { %v678_v14 = vpop.xlane.xlu1 %677 }
 0x2f2   : > { %1317 = vpow2.f32 %v755_v12  ;;  %v721_v15 = vsub.f32 %v1807_v23, %v678_v14  ;;  %v722_v16 = vsub.f32 %v1811_v25, %v678_v14 }
 0x2f3   : > { %1319 = vpow2.f32 %v757_v13 }
 0x2f4   : > { %v1895_v17 = vpop.eup %1309  ;;  %v759_v18 = vmul.f32 1.442695, %v721_v15  ;;  %v761_v19 = vmul.f32 1.442695, %v722_v16 }
 0x2f5   : > { %v1897_v20 = vpop.eup %1311  ;;  %v681_v24 = vpop.xlane.xlu0 %680 }
 0x2f6   : > { %1321 = vpow2.f32 %v759_v18  ;;  %v723_v21 = vsub.f32 %v1815_v27, %v681_v24  ;;  %v724_v22 = vsub.f32 %v1817_v28, %v681_v24  ;;  %v811_v26 = vadd.f32 %v1897_v20, %v1895_v17 }
 0x2f7   : > { %1323 = vpow2.f32 %v761_v19  ;;  %v684_v23 = vpop.xlane.xlu1 %683 }
 0x2f8   : > { %v1903_v30 = vpop.eup %1313  ;;  %v763_v25 = vmul.f32 1.442695, %v723_v21  ;;  %v765_v32 = vmul.f32 1.442695, %v724_v22  ;;  %v725_v36 = vsub.f32 %v1819_v29, %v684_v23  ;;  %v726_v38 = vsub.f32 %v1823_v31, %v684_v23  ;;  %812 = vadd.xlane.f32.xlu0 %v811_v26 }
 0x2f9   : > { %v1907_v42 = vpop.eup %1315 }
 0x2fa   : > { %1325 = vpow2.f32 %v763_v25  ;;  %v767_v27 = vmul.f32 1.442695, %v725_v36  ;;  %v769_v44 = vmul.f32 1.442695, %v726_v38  ;;  %v814_v28 = vadd.f32 %v1907_v42, %v1903_v30 }
 0x2fb   : > { %1327 = vpow2.f32 %v765_v32 }
 0x2fc   : > { %v1911_v48 = vpop.eup %1317  ;;  %1329 = vpow2.f32 %v767_v27  ;;  %815 = vadd.xlane.f32.xlu1 %v814_v28 }
 0x2fd   : > { %v1913_v50 = vpop.eup %1319  ;;  %1331 = vpow2.f32 %v769_v44  ;;  %v687_v29 = vpop.xlane.xlu0 %686 }
 0x2fe   : > { %v727_v31 = vsub.f32 %v1827_v33, %v687_v29  ;;  %v728_v54 = vsub.f32 %v1829_v34, %v687_v29  ;;  %v817_v56 = vadd.f32 %v1913_v50, %v1911_v48 }
 0x2ff   : > { %v690_v60 = vpop.xlane.xlu1 %689 }
 0x300   : > { %v1919_v62 = vpop.eup %1321  ;;  %v771_v63 = vmul.f32 1.442695, %v727_v31  ;;  %v773_v0 = vmul.f32 1.442695, %v728_v54  ;;  %v729_v1 = vsub.f32 %v1831_v35, %v690_v60  ;;  %v730_v2 = vsub.f32 %v1835_v37, %v690_v60  ;;  %818 = vadd.xlane.f32.xlu0 %v817_v56 }
 0x301   : > { %v1923_v3 = vpop.eup %1323 }
 0x302   : > { %1333 = vpow2.f32 %v771_v63  ;;  %v775_v4 = vmul.f32 1.442695, %v729_v1  ;;  %v777_v33 = vmul.f32 1.442695, %v730_v2  ;;  %v820_v34 = vadd.f32 %v1923_v3, %v1919_v62 }
 0x303   : > { %1335 = vpow2.f32 %v773_v0 }
 0x304   : > { %v1927_v5 = vpop.eup %1325  ;;  %1337 = vpow2.f32 %v775_v4  ;;  %821 = vadd.xlane.f32.xlu1 %v820_v34 }
 0x305   : > { %v1929_v6 = vpop.eup %1327  ;;  %1339 = vpow2.f32 %v777_v33  ;;  %v693_v35 = vpop.xlane.xlu0 %692 }
 0x306   : > { %v1931_v7 = vpop.eup %1329  ;;  %v731_v37 = vsub.f32 %v1839_v39, %v693_v35  ;;  %v732_v8 = vsub.f32 %v1841_v40, %v693_v35  ;;  %v823_v9 = vadd.f32 %v1929_v6, %v1927_v5 }
 0x307   : > { %v1937_v10 = vpop.eup %1331  ;;  %v696_v11 = vpop.xlane.xlu1 %695 }
 0x308   : > { %v779_v12 = vmul.f32 1.442695, %v731_v37  ;;  %v781_v13 = vmul.f32 1.442695, %v732_v8  ;;  %v733_v14 = vsub.f32 %v1843_v41, %v696_v11  ;;  %v734_v15 = vsub.f32 %v1847_v43, %v696_v11  ;;  %824 = vadd.xlane.f32.xlu0 %v823_v9 }
 0x309   : > { %v826_v16 = vadd.f32 %v1937_v10, %v1931_v7 }
 0x30a   : > { %1341 = vpow2.f32 %v779_v12  ;;  %v783_v39 = vmul.f32 1.442695, %v733_v14  ;;  %v785_v18 = vmul.f32 1.442695, %v734_v15 }
 0x30b   : > { %1343 = vpow2.f32 %v781_v13  ;;  %827 = vadd.xlane.f32.xlu1 %v826_v16 }
 0x30c   : > { %v1943_v40 = vpop.eup %1333  ;;  %1345 = vpow2.f32 %v783_v39 }
 0x30d   : > { %v1945_v19 = vpop.eup %1335  ;;  %1347 = vpow2.f32 %v785_v18  ;;  %v699_v24 = vpop.xlane.xlu0 %698 }
 0x30e   : > { %v1947_v21 = vpop.eup %1337  ;;  %v735_v41 = vsub.f32 %v1851_v45, %v699_v24  ;;  %v736_v43 = vsub.f32 %v1853_v46, %v699_v24  ;;  %v829_v22 = vadd.f32 %v1945_v19, %v1943_v40 }
 0x30f   : > { %v1953_v26 = vpop.eup %1339  ;;  %v702_v23 = vpop.xlane.xlu1 %701 }
 0x310   : > { %v787_v25 = vmul.f32 1.442695, %v735_v41  ;;  %v789_v32 = vmul.f32 1.442695, %v736_v43  ;;  %v737_v36 = vsub.f32 %v1855_v47, %v702_v23  ;;  %v738_v38 = vsub.f32 %v1859_v49, %v702_v23  ;;  %830 = vadd.xlane.f32.xlu0 %v829_v22 }
 0x311   : > { %v832_v27 = vadd.f32 %v1953_v26, %v1947_v21 }
 0x312   : > { %1349 = vpow2.f32 %v787_v25  ;;  %v791_v45 = vmul.f32 1.442695, %v737_v36  ;;  %v793_v44 = vmul.f32 1.442695, %v738_v38  ;;  %v2015_v38 = vld [vmem:[#allocation2] sm:$0xff] }
 0x313   : > { %1351 = vpow2.f32 %v789_v32  ;;  %833 = vadd.xlane.f32.xlu1 %v832_v27  ;;  %v909_v27 = vcombine.high %v2015_v38, %v2015_v38 }
 0x314   : > { %v1959_v46 = vpop.eup %1341  ;;  %1353 = vpow2.f32 %v791_v45 }
 0x315   : > { %v1961_v28 = vpop.eup %1343  ;;  %1355 = vpow2.f32 %v793_v44  ;;  %v705_v29 = vpop.xlane.xlu0 %704  ;;  %v912_v45 = vpack.c.bf16 %v909_v27, %v909_v27 }
 0x316   : > { %v1963_v31 = vpop.eup %1345  ;;  %v739_v47 = vsub.f32 %v1863_v51, %v705_v29  ;;  %v740_v49 = vsub.f32 %v1865_v52, %v705_v29  ;;  %v835_v54 = vadd.f32 %v1961_v28, %v1959_v46 }
 0x317   : > { %v1969_v56 = vpop.eup %1347  ;;  %v708_v60 = vpop.xlane.xlu1 %707  ;;  %961 = vmatprep.mubr.bf16.mxu1 %v912_v45 }
 0x318   : > { %v795_v63 = vmul.f32 1.442695, %v739_v47  ;;  %v797_v0 = vmul.f32 1.442695, %v740_v49  ;;  %v741_v1 = vsub.f32 %v1867_v53, %v708_v60  ;;  %v742_v2 = vsub.f32 %v1871_v55, %v708_v60  ;;  %836 = vadd.xlane.f32.xlu0 %v835_v54 }
 0x319   : > { %v838_v4 = vadd.f32 %v1969_v56, %v1963_v31 }
 0x31a   : > { %1357 = vpow2.f32 %v795_v63  ;;  %v799_v51 = vmul.f32 1.442695, %v741_v1  ;;  %v801_v33 = vmul.f32 1.442695, %v742_v2 }
 0x31b   : > { %1359 = vpow2.f32 %v797_v0  ;;  %839 = vadd.xlane.f32.xlu1 %v838_v4 }
 0x31c   : > { %v1975_v52 = vpop.eup %1349  ;;  %1361 = vpow2.f32 %v799_v51 }
 0x31d   : > { %v1977_v34 = vpop.eup %1351  ;;  %1363 = vpow2.f32 %v801_v33  ;;  %v711_v35 = vpop.xlane.xlu0 %710 }
 0x31e   : > { %v1979_v37 = vpop.eup %1353  ;;  %v743_v53 = vsub.f32 %v1875_v57, %v711_v35  ;;  %v744_v55 = vsub.f32 %v1877_v58, %v711_v35  ;;  %v841_v8 = vadd.f32 %v1977_v34, %v1975_v52 }
 0x31f   : > { %v1985_v9 = vpop.eup %1355  ;;  %v714_v11 = vpop.xlane.xlu1 %713 }
 0x320   : > { %v803_v12 = vmul.f32 1.442695, %v743_v53  ;;  %v805_v13 = vmul.f32 1.442695, %v744_v55  ;;  %842 = vadd.xlane.f32.xlu0 %v841_v8  ;;  %v745_v14 = vsub.f32 %v1879_v59, %v714_v11  ;;  %v746_v15 = vsub.f32 %v1883_v61, %v714_v11 }
 0x321   : > { %v844_v16 = vadd.f32 %v1985_v9, %v1979_v37 }
 0x322   : > { %1365 = vpow2.f32 %v803_v12  ;;  %v807_v57 = vmul.f32 1.442695, %v745_v14  ;;  %v809_v39 = vmul.f32 1.442695, %v746_v15 }
 0x323   : > { %1367 = vpow2.f32 %v805_v13  ;;  %845 = vadd.xlane.f32.xlu1 %v844_v16 }
 0x324   : > { %v1991_v58 = vpop.eup %1357  ;;  %1369 = vpow2.f32 %v807_v57 }
 0x325   : > { %v1993_v18 = vpop.eup %1359  ;;  %1371 = vpow2.f32 %v809_v39 }
 0x326   : > { %v1995_v24 = vpop.eup %1361  ;;  %v847_v59 = vadd.f32 %v1993_v18, %v1991_v58 }
 0x327   : > { %v1999_v61 = vpop.eup %1363 }
 0x328   : > { %848 = vadd.xlane.f32.xlu0 %v847_v59  ;;  %v850_v41 = vadd.f32 %v1999_v61, %v1995_v24 }
 0x32a   : > { %851 = vadd.xlane.f32.xlu1 %v850_v41 }
 0x32c   : > { %v2003_v43 = vpop.eup %1365 }
 0x32d   : > { %v2005_v22 = vpop.eup %1367 }
 0x32e   : > { %v2007_v23 = vpop.eup %1369  ;;  %v853_v25 = vadd.f32 %v2005_v22, %v2003_v43 }
 0x32f   : > { %v2011_v32 = vpop.eup %1371 }
 0x330   : > { %854 = vadd.xlane.f32.xlu0 %v853_v25  ;;  %v856_v36 = vadd.f32 %v2011_v32, %v2007_v23 }
 0x332   : > { %857 = vadd.xlane.f32.xlu1 %v856_v36 }
 0x385   : > { %v813_v44 = vpop.xlane.xlu0 %812 }
 0x386   : > { %1373 = vrcp.f32 %v813_v44 }
 0x389   : > { %v816_v29 = vpop.xlane.xlu1 %815 }
 0x38a   : > { %1375 = vrcp.f32 %v816_v29 }
 0x38d   : > { %v819_v47 = vpop.xlane.xlu0 %818 }
 0x38e   : > { %1377 = vrcp.f32 %v819_v47 }
 0x390   : > { %v1374_v54 = vpop.eup %1373 }
 0x391   : > { %v822_v49 = vpop.xlane.xlu1 %821  ;;  %v876_v0 = vmul.f32 %v1374_v54, %v1897_v20  ;;  %v875_v2 = vmul.f32 %v1374_v54, %v1895_v17 }
 0x392   : > { %1379 = vrcp.f32 %v822_v49 }
 0x394   : > { %v1376_v60 = vpop.eup %1375 }
 0x395   : > { %v825_v63 = vpop.xlane.xlu0 %824  ;;  %v878_v1 = vmul.f32 %v1376_v60, %v1907_v42  ;;  %v877_v4 = vmul.f32 %v1376_v60, %v1903_v30 }
 0x396   : > { %1381 = vrcp.f32 %v825_v63 }
 0x397   : > { %v914_v51 = vpack.c.bf16 %v878_v1, %v876_v0  ;;  %v913_v33 = vpack.c.bf16 %v877_v4, %v875_v2 }
 0x398   : > { %v828_v35 = vpop.xlane.xlu1 %827  ;;  %v1378_v53 = vpop.eup %1377 }
 0x399   : > { %1383 = vrcp.f32 %v828_v35  ;;  %929 = vmatprep.subr.bf16.mxu1 %v914_v51  ;;  %v880_v11 = vmul.f32 %v1378_v53, %v1913_v50  ;;  %v879_v42 = vmul.f32 %v1378_v53, %v1911_v48 }
 0x39a   : > { %930 = vmatpush1.bf16.xpose.msra.mxu1 %v913_v33 }
 0x39c   : > { %v1380_v55 = vpop.eup %1379 }
 0x39d   : > { %v831_v8 = vpop.xlane.xlu0 %830  ;;  %v882_v20 = vmul.f32 %v1380_v55, %v1923_v3  ;;  %v881_v17 = vmul.f32 %v1380_v55, %v1919_v62 }
 0x39e   : > { %1385 = vrcp.f32 %v831_v8 }
 0x39f   : > { %v916_v30 = vpack.c.bf16 %v882_v20, %v880_v11  ;;  %v915_v12 = vpack.c.bf16 %v881_v17, %v879_v42 }
 0x3a0   : > { %v834_v13 = vpop.xlane.xlu1 %833  ;;  %v1382_v14 = vpop.eup %1381 }
 0x3a1   : > { %1387 = vrcp.f32 %v834_v13  ;;  %931 = vmatprep.subr.bf16.mxu1 %v916_v30  ;;  %v884_v16 = vmul.f32 %v1382_v14, %v1929_v6  ;;  %v883_v48 = vmul.f32 %v1382_v14, %v1927_v5  ;;  %v911_v30 = vpack.c.bf16 %v2015_v38, %v2015_v38 }
 0x3a2   : > { %932 = vmatpush1.bf16.xpose.msra.mxu1 %v915_v12 }
 0x3a3   : > { %v1384_v15 = vpop.eup %1383 }
 0x3a4   : > { %v886_v57 = vmul.f32 %v1384_v15, %v1937_v10  ;;  %v885_v50 = vmul.f32 %v1384_v15, %v1931_v7 }
 0x3a5   : > { %v837_v3 = vpop.xlane.xlu0 %836 }
 0x3a6   : > { %v918_v39 = vpack.c.bf16 %v886_v57, %v884_v16  ;;  %1389 = vrcp.f32 %v837_v3  ;;  %v917_v59 = vpack.c.bf16 %v885_v50, %v883_v48 }
 0x3a8   : > { %933 = vmatprep.subr.bf16.mxu1 %v918_v39  ;;  %v840_v62 = vpop.xlane.xlu1 %839  ;;  %v1386_v41 = vpop.eup %1385 }
 0x3a9   : > { %1391 = vrcp.f32 %v840_v62  ;;  %v888_v36 = vmul.f32 %v1386_v41, %v1945_v19  ;;  %v887_v45 = vmul.f32 %v1386_v41, %v1943_v40 }
 0x3aa   : > { %934 = vmatpush1.bf16.xpose.msra.mxu1 %v917_v59 }
 0x3ab   : > { %v1388_v25 = vpop.eup %1387 }
 0x3ac   : > { %v890_v6 = vmul.f32 %v1388_v25, %v1953_v26  ;;  %v889_v10 = vmul.f32 %v1388_v25, %v1947_v21 }
 0x3ad   : > { %v843_v27 = vpop.xlane.xlu0 %842 }
 0x3ae   : > { %v920_v7 = vpack.c.bf16 %v890_v6, %v888_v36  ;;  %1393 = vrcp.f32 %v843_v27  ;;  %v919_v44 = vpack.c.bf16 %v889_v10, %v887_v45 }
 0x3b0   : > { %935 = vmatprep.subr.bf16.mxu1 %v920_v7  ;;  %v846_v5 = vpop.xlane.xlu1 %845  ;;  %v1390_v29 = vpop.eup %1389 }
 0x3b1   : > { %1395 = vrcp.f32 %v846_v5  ;;  %v892_v49 = vmul.f32 %v1390_v29, %v1961_v28  ;;  %v891_v60 = vmul.f32 %v1390_v29, %v1959_v46 }
 0x3b2   : > { %936 = vmatpush1.bf16.xpose.msra.mxu1 %v919_v44 }
 0x3b3   : > { %v1392_v47 = vpop.eup %1391 }
 0x3b4   : > { %v894_v19 = vmul.f32 %v1392_v47, %v1969_v56  ;;  %v893_v26 = vmul.f32 %v1392_v47, %v1963_v31 }
 0x3b5   : > { %v849_v54 = vpop.xlane.xlu0 %848 }
 0x3b6   : > { %1397 = vrcp.f32 %v849_v54  ;;  %v922_v21 = vpack.c.bf16 %v894_v19, %v892_v49  ;;  %v921_v63 = vpack.c.bf16 %v893_v26, %v891_v60 }
 0x3b7   : > { %v852_v40 = vpop.xlane.xlu1 %851 }
 0x3b8   : > { %937 = vmatprep.subr.bf16.mxu1 %v922_v21  ;;  %1399 = vrcp.f32 %v852_v40  ;;  %v1394_v0 = vpop.eup %1393 }
 0x3b9   : > { %v896_v2 = vmul.f32 %v1394_v0, %v1977_v34  ;;  %v895_v51 = vmul.f32 %v1394_v0, %v1975_v52 }
 0x3ba   : > { %938 = vmatpush1.bf16.xpose.msra.mxu1 %v921_v63 }
 0x3bb   : > { %v1396_v1 = vpop.eup %1395 }
 0x3bc   : > { %v898_v28 = vmul.f32 %v1396_v1, %v1985_v9  ;;  %v897_v56 = vmul.f32 %v1396_v1, %v1979_v37 }
 0x3bd   : > { %v855_v4 = vpop.xlane.xlu0 %854 }
 0x3be   : > { %1401 = vrcp.f32 %v855_v4  ;;  %v924_v31 = vpack.c.bf16 %v898_v28, %v896_v2  ;;  %v923_v35 = vpack.c.bf16 %v897_v56, %v895_v51 }
 0x3bf   : > { %v858_v33 = vpop.xlane.xlu1 %857 }
 0x3c0   : > { %v1398_v46 = vpop.eup %1397  ;;  %939 = vmatprep.subr.bf16.mxu1 %v924_v31  ;;  %1403 = vrcp.f32 %v858_v33 }
 0x3c1   : > { %v900_v55 = vmul.f32 %v1398_v46, %v1993_v18  ;;  %v899_v37 = vmul.f32 %v1398_v46, %v1991_v58 }
 0x3c2   : > { %v1400_v53 = vpop.eup %1399  ;;  %940 = vmatpush1.bf16.xpose.msra.mxu1 %v923_v35 }
 0x3c3   : > { %v902_v34 = vmul.f32 %v1400_v53, %v1999_v61  ;;  %v901_v9 = vmul.f32 %v1400_v53, %v1995_v24 }
 0x3c5   : > { %v926_v8 = vpack.c.bf16 %v902_v34, %v900_v55  ;;  %v925_v11 = vpack.c.bf16 %v901_v9, %v899_v37 }
 0x3c7   : > { %941 = vmatprep.subr.bf16.mxu1 %v926_v8 }
 0x3c8   : > { %v1402_v52 = vpop.eup %1401 }
 0x3c9   : > { %v904_v42 = vmul.f32 %v1402_v52, %v2005_v22  ;;  %v903_v58 = vmul.f32 %v1402_v52, %v2003_v43  ;;  %v970_v22 = vld [vmem:[%s1647_s26] sm:$0xf]  ;;  %s979_s26 = scalar_lea.sflag [#allocation6], %s1632_s8 }
 0x3ca   : > { %v1404_v20 = vpop.eup %1403  ;;  %942 = vmatpush1.bf16.xpose.msra.mxu1 %v925_v11 }
 0x3cb   : > { %v906_v18 = vmul.f32 %v1404_v20, %v2011_v32  ;;  %v905_v61 = vmul.f32 %v1404_v20, %v2007_v23 }
 0x3cd   : > { %v928_v24 = vpack.c.bf16 %v906_v18, %v904_v42  ;;  %v927_v17 = vpack.c.bf16 %v905_v61, %v903_v58 }
 0x3cf   : > { %943 = vmatprep.subr.bf16.mxu1 %v928_v24 }
 0x3d2   : > { %944 = vmatpush1.bf16.xpose.msra.mxu1 %v927_v17 }
 0x3d9   : > { %962 = vmatmul.mubr.bf16.vlgmr.msra.gmra.mrb[0].mxu1 %v911_v30 }
 0x4ac   : > { %v963_v43 = vpop.f32.mrb[0].mxu1 }
 0x4ad   : > { %969 = vst [vmem:[%s1651_s21] sm:$0xf] %v963_v43  ;;  %v971_v23 = vadd.f32 %v970_v22, %v963_v43  ;;  %v965_v32 = vpop.f32.mrb[1].mxu1  ;;  %s1411_s21 = scalar_lea.vmem %s1410_s12, 128 }
 0x4ae   : > { %v966_v38 = vpop.f32.mrb[2].mxu1  ;;  %p1413_p6 = scmp.lt.s32.totalorder %s1411_s21, %s1405_s10 }
 0x4b0   : > { %p1414_p7 = por %p1413_p6, %p1412_p5 }
 0x4b2   : > { %p1415_p9 = pnand %p1414_p7, %p1408_p4 }
 0x4b4   : > { %1418 = shalt.err (!%p1415_p9)
}
 0x4b5   : > { %s1419_s13 = scalar_lea.hbm %s2061_s6, 64  ;;  %s1423_s30 = scalar_lea.hbm %s2150_s4, 256 }
 0x4b6   : > { %p1420_p10 = scmp.ne.s32.totalorder %s2061_s6, %s1419_s13  ;;  %p1424_p13 = scmp.lt.u32.totalorder %s2061_s6, %s2150_s4 }
 0x4b7   : > { %p1425_p0 = scmp.lt.u32.totalorder %s1423_s30, %s1419_s13  ;;  %p1427_p2 = scmp.lt.u32.totalorder %s1419_s13, %s2061_s6 }
 0x4b8   : > { %p1421_p11 = pnand %p1420_p10, %p1611_p3 }
 0x4b9   : > { %p1426_p1 = por %p1425_p0, %p1424_p13 }
 0x4ba   : > { %p1422_p12 = pneg %p1421_p11 }
 0x4bb   : > { %p1428_p4 = por %p1427_p2, %p1426_p1 }
 0x4bd   : > { %p1429_p5 = pnand %p1428_p4, %p1422_p12 }
 0x4bf   : > { %1432 = shalt.err (!%p1429_p5)
}
 0x4c0   : > { %1233 = dma.vmem_to_hbm [thread:$0]  (%p1611_p3), %s2063_s24, 64, %s2061_s6, %s979_s26   ;;  %972 = vst [vmem:[%s1649_s25] sm:$0xf] %v971_v23  ;;  %v967_v12 = vpop.f32.mrb[3].mxu1 }
 0x4c1   : > { %s974_s19 = scalar_lea.sflag [#allocation4], %s1632_s8  ;;  %s1433_s10 = scalar_lea.vmem %s2071_s27, 64 }
 0x4c2   : > { %p1434_p6 = scmp.ne.s32.totalorder %s2071_s27, %s1433_s10  ;;  %s1534_s11 = smov [#allocation3]  }
 0x4c3   : > { %s1437_s12 = sshll.u32 %s1534_s11, 4  ;;  %s1438_s12 = int_to_ptr.vmem [resolvable:$false] %s1437_s12 }
 0x4c4   : > { %p1435_p7 = pnand %p1434_p6, %p1611_p3  ;;  %s1439_s21 = scalar_lea.vmem %s1438_s12, 128 }
 0x4c5   : > { %p1440_p10 = scmp.lt.s32.totalorder %s2071_s27, %s1438_s12  ;;  %p1441_p11 = scmp.lt.s32.totalorder %s1439_s21, %s1433_s10 }
 0x4c6   : > { %p1436_p9 = pneg %p1435_p7 }
 0x4c7   : > { %p1442_p12 = por %p1441_p11, %p1440_p10 }
 0x4c9   : > { %p1443_p13 = pnand %p1442_p12, %p1436_p9 }
 0x4cb   : > { %1446 = shalt.err (!%p1443_p13)
}
 0x4cc   : > { %s1447_s25 = scalar_lea.hbm %s2069_s9, 64  ;;  %s1451_s6 = scalar_lea.hbm %s2149_s3, 256 }
 0x4cd   : > { %p1448_p0 = scmp.ne.s32.totalorder %s2069_s9, %s1447_s25  ;;  %p1452_p4 = scmp.lt.u32.totalorder %s2069_s9, %s2149_s3 }
 0x4ce   : > { %p1453_p5 = scmp.lt.u32.totalorder %s1451_s6, %s1447_s25  ;;  %p1455_p7 = scmp.lt.u32.totalorder %s1447_s25, %s2069_s9 }
 0x4cf   : > { %p1449_p1 = pnand %p1448_p0, %p1611_p3 }
 0x4d0   : > { %p1454_p6 = por %p1453_p5, %p1452_p4 }
 0x4d1   : > { %p1450_p2 = pneg %p1449_p1 }
 0x4d2   : > { %p1456_p9 = por %p1455_p7, %p1454_p6 }
 0x4d4   : > { %p1457_p10 = pnand %p1456_p9, %p1450_p2 }
 0x4d6   : > { %1460 = shalt.err (!%p1457_p10)
}
 0x4d7   : > { %1232 = dma.vmem_to_hbm [thread:$0]  (%p1611_p3), %s2071_s27, 64, %s2069_s9, %s974_s19  }
 0x4d8 PF: > { %p1243_p11 = scmp.ge.s32.totalorder %s1531_s22, 2  ;;  %s1021_s14 = sand.u32 1, %s1503_s15  }
 0x4d9   : > { %s1022_s23 = scalar_lea.sflag [#allocation4], %s1021_s14 }
 0x4da   : > { %p1237_p12 = pnand %p1243_p11, %p1620_p8 }
 0x4dc   : > { %1494 = dma.done.wait (!%p1237_p12), %s1022_s23, 64  }
 0x4dd   : > { %1496 = vsyncadd (!%p1237_p12), %s1022_s23, 4294967232  ;;  %s1031_s30 = scalar_lea.sflag [#allocation6], %s1021_s14 }
 0x4de   : > { %1498 = dma.done.wait (!%p1237_p12), %s1031_s30, 64  }
 0x4df   : > { %1500 = vsyncadd (!%p1237_p12), %s1031_s30, 4294967232  ;;  %s21_s22 = sadd.s32 1, %s1531_s22   ;;  %s2159_s19 = sld [smem:[#allocation9_spill]] }
 0x4e0   : > { %p18_p13 = scmp.ge.s32.totalorder %s21_s22, 6   ;;  %s2160_s28 = sld [smem:[#allocation10_spill]] }
 0x4e1   : > { %s2161_s21 = sld [smem:[#allocation11_spill]]  ;;  %s2162_s15 = smov %s1507_s16 }
 0x4e2   : > { %s2163_s16 = smov %s1511_s17  ;;  %s2164_s17 = smov %s1629_s7 }
 0x4e3   : > { %s2165_s18 = smov %s1523_s20  ;;  %20 = sbr.rel (!%p18_p13) target bundleno = 7 (0x7), region = 92 }
 0x4e6   : > { %s2166_s20 = smov %s2160_s28 }
 0x4ea   :  { %1036 = vsyncpa [#allocation4], 1 }
 0x4eb   :  { %1038 = vsyncpa [#allocation4 + $0x1], 1 }
 0x4ec   :  { %1039 = vsyncpa [#allocation6], 1 }
 0x4ed   :  { %1041 = vsyncpa [#allocation6 + $0x1], 1 }

</bundles_post_ra>
